<compile_context>
chip_gen: v7x
topology: tpu7x:2x2x1
jax: 0.10.0
libtpu: 0.0.40
codegen_flags: <defaults>
</compile_context>

<pallas_src>
import functools

import jax
import jax.numpy as jnp
from jax.experimental import pallas as pl
from jax.experimental.pallas import tpu as pltpu


def _conv2d_kernel(w_ref, b_ref, *refs, kh, kw, hp, w_pad):
    """One (tm, w_pad) output row tile of the cross-correlation.

    w_ref : (kh, kw) weights in SMEM (scalar reads)
    b_ref : (1,)     bias in SMEM
    refs  : (x_ref, [halo_ref,] o_ref)
            x_ref    (tm, w_pad) VMEM : this tile's own input rows
            halo_ref (hp, w_pad) VMEM : the next hp input rows (only if kh > 1)
            o_ref    (tm, w_pad) VMEM : output tile
    """
    if kh > 1:
        x_ref, halo_ref, o_ref = refs
    else:
        (x_ref, o_ref), halo_ref = refs, None
    tm = o_ref.shape[0]

    # Load + cast each input byte exactly once.
    x = x_ref[...].astype(jnp.float32)
    if kh > 1:
        xh = jnp.concatenate([x, halo_ref[...].astype(jnp.float32)], axis=0)
    else:
        xh = x
    n = tm + hp

    # Bias folded into the accumulator init (saves one full-tile VALU pass).
    acc = jnp.full((tm, w_pad), b_ref[0], dtype=jnp.float32)

    for di in range(kh):
        if di == 0:
            xr = x
        else:
            # Sublane rotate (XLU): row r picks up xh[r + di].  Since
            # di <= kh - 1 <= hp, the wrap never reaches rows r < tm, so the
            # aligned [:tm] slice contains exactly rows r + di.
            xr = pltpu.roll(xh, shift=n - di, axis=0)[:tm]
        for dj in range(kw):
            # Lane rotate (XLU): column c picks up value at column c + dj.
            # Wrap safety: for valid output columns c < wo, c + dj <= w - 1 <
            # w_pad, so wrapped lanes only land in padded columns >= wo which
            # the wrapper slices away.  (Re-establish this invariant if width
            # tiling is ever added.)
            xs = xr if dj == 0 else pltpu.roll(xr, shift=w_pad - dj, axis=1)
            acc = acc + w_ref[di, dj] * xs

    o_ref[...] = acc.astype(o_ref.dtype)


def conv2d_forward(x, weight, bias, *, tm=256):
    """Pallas equivalent of Conv2D.forward(x) == corr2d(x, weight) + bias."""
    h, w = x.shape
    kh, kw = weight.shape
    ho, wo = h - kh + 1, w - kw + 1
    assert ho >= 1 and wo >= 1, "kernel larger than input"

    # Lane-dense padded width (multiple of 128) -> unmasked full-lane stores.
    w_pad = pl.cdiv(w, 128) * 128
    assert w <= w_pad  # lane-roll wrap only pollutes columns >= wo (sliced off)

    # Row halo: kh-1 extra rows per tile, rounded up to a sublane multiple.
    hp = pl.cdiv(kh - 1, 8) * 8 if kh > 1 else 0

    # ---- row-tile (tm) selection -------------------------------------------
    tm = max(8, (tm // 8) * 8)
    ho_ceil8 = pl.cdiv(ho, 8) * 8
    tm = min(tm, ho_ceil8)
    # Keep >= 2 grid steps so the "parallel" row axis can be sharded across
    # v7x's two TensorCores (costs nothing on single-TC v5e/v6e).
    if ho_ceil8 >= 16:
        tm = min(tm, pl.cdiv(pl.cdiv(ho, 2), 8) * 8)
    if hp:
        tm = max(hp, (tm // hp) * hp)      # halo index map needs tm % hp == 0

    # Generation-aware VMEM budget (v5e/v6e: 128 MiB, v7x: 64 MiB per TC).
    try:
        vmem_cap = int(pltpu.get_tpu_info().vmem_capacity_bytes)
    except Exception:
        vmem_cap = 64 << 20

    def working_set_bytes(t):
        ib = x.dtype.itemsize
        dbuf = 2 * ((t + hp) * w_pad * ib + t * w_pad * 4)   # double-buffered in/out
        temps = (3 * (t + hp) + 2 * t) * w_pad * 4           # in-kernel f32 temporaries
        return dbuf + temps

    ws_cap = (vmem_cap * 3) // 8           # ~24 MiB on v7x, ~48 MiB on v5e/v6e
    floor_tm = max(8, hp)
    while tm > floor_tm and working_set_bytes(tm) > ws_cap:
        new_tm = max(8, (tm // 2 // 8) * 8)
        if hp:
            new_tm = max(hp, (new_tm // hp) * hp)
        if new_tm == tm:
            break
        tm = new_tm
    # TODO(synk): add a second (width) grid axis with a kw-1 column halo for
    # very wide inputs (w_pad >~ 8-16K lanes) so tm doesn't collapse and the
    # working set stays inside v7x's 64 MiB VMEM.

    ho_pad = pl.cdiv(ho, tm) * tm
    grid = (ho_pad // tm,)
    rows_needed = ho_pad + hp              # >= h, so halo DMAs never run OOB

    # ---- single padded input (skipped entirely when already aligned) --------
    pad_r, pad_c = rows_needed - h, w_pad - w
    x_p = x if (pad_r == 0 and pad_c == 0) else jnp.pad(x, ((0, pad_r), (0, pad_c)))

    kernel = functools.partial(_conv2d_kernel, kh=kh, kw=kw, hp=hp, w_pad=w_pad)

    in_specs = [
        pl.BlockSpec(memory_space=pltpu.MemorySpace.SMEM),    # weight (scalars)
        pl.BlockSpec(memory_space=pltpu.MemorySpace.SMEM),    # bias   (scalar)
        pl.BlockSpec((tm, w_pad), lambda i: (i, 0)),           # main row tile
    ]
    args = [weight, bias, x_p]
    if kh > 1:
        # Row halo: the next hp rows of the SAME padded array (tiny extra DMA;
        # replaces the kh row-shifted wrapper copies of the previous version).
        # If exposed DMA shows up on v5e, add pipeline_mode=pl.Buffered(3) here.
        in_specs.append(
            pl.BlockSpec((hp, w_pad), lambda i: ((i + 1) * tm // hp, 0)))
        args.append(x_p)

    est = working_set_bytes(tm)
    vmem_limit = int(min((vmem_cap * 3) // 4, max(2 * est, 32 << 20)))

    y_pad = pl.pallas_call(
        kernel,
        out_shape=jax.ShapeDtypeStruct((ho_pad, w_pad), jnp.float32),
        grid_spec=pltpu.PrefetchScalarGridSpec(
            num_scalar_prefetch=0,
            grid=grid,
            in_specs=in_specs,
            out_specs=pl.BlockSpec((tm, w_pad), lambda i: (i, 0)),
        ),
        compiler_params=pltpu.CompilerParams(
            dimension_semantics=("parallel",),
            vmem_limit_bytes=vmem_limit,
        ),
    )(*args)

    # Valid region.  Skipped when it is a no-op; downstream consumers able to
    # handle the padded (ho_pad, w_pad) buffer should take y_pad directly to
    # avoid this extra output-side HBM pass.
    if ho_pad == ho and w_pad == wo:
        return y_pad
    return y_pad[:ho, :wo]


def corr2d_ref(x, k):
    """Pure-JAX reference matching the PyTorch corr2d semantics."""
    kh, kw = k.shape
    ho, wo = x.shape[0] - kh + 1, x.shape[1] - kw + 1
    y = jnp.zeros((ho, wo), jnp.float32)
    for di in range(kh):
        for dj in range(kw):
            y = y + k[di, dj] * x[di:di + ho, dj:dj + wo]
    return y


if __name__ == "__main__":
    key = jax.random.PRNGKey(0)
    k_w, k_b, k_x = jax.random.split(key, 3)

    # Module: Conv2D(kernel_size=(1, 2))  (same shape as K = [[1, -1]])
    kernel_size = (1, 2)
    weight = jax.random.normal(k_w, kernel_size, dtype=jnp.float32)
    bias = jax.random.normal(k_b, (1,), dtype=jnp.float32)

    # Input: 8x8 like the script's X = torch.rand(8, 8)
    x = jax.random.uniform(k_x, (8, 8), dtype=jnp.float32)

    y = jax.block_until_ready(conv2d_forward(x, weight, bias))
    y_ref = corr2d_ref(x, weight) + bias[0]
    assert y.shape == (8, 7), y.shape
    assert jnp.allclose(y, y_ref, atol=1e-5, rtol=1e-5), "mismatch vs reference"

    # kh > 1, multi-row-tile, lane-padded path (exercises the row halo).
    weight2 = jax.random.normal(k_w, (2, 3), dtype=jnp.float32)
    x2 = jax.random.uniform(k_x, (40, 200), dtype=jnp.float32)
    y2 = jax.block_until_ready(conv2d_forward(x2, weight2, bias, tm=16))
    y2_ref = corr2d_ref(x2, weight2) + bias[0]
    assert y2.shape == (39, 198), y2.shape
    assert jnp.allclose(y2, y2_ref, atol=1e-4, rtol=1e-4), "mismatch (kh>1)"

    # bf16 input path (halved input-side HBM bytes; f32 accumulate/output).
    weight3 = jax.random.normal(k_w, (3, 3), dtype=jnp.float32)
    x3 = jax.random.uniform(k_x, (24, 100), dtype=jnp.float32).astype(jnp.bfloat16)
    y3 = jax.block_until_ready(conv2d_forward(x3, weight3, bias))
    y3_ref = corr2d_ref(x3.astype(jnp.float32), weight3) + bias[0]
    assert y3.shape == (22, 98), y3.shape
    assert jnp.allclose(y3, y3_ref, atol=1e-4, rtol=1e-4), "mismatch (bf16)"

    print("KERNEL_OK")
</pallas_src>

<mosaic_0001>
module attributes {stable_mosaic.version = 11 : i64} {
  func.func @_conv2d_kernel(%arg0: i32, %arg1: memref<1x2xf32, #tpu.memory_space<smem>>, %arg2: memref<1xf32, #tpu.memory_space<smem>>, %arg3: memref<8x128xf32, #tpu.memory_space<vmem>>, %arg4: memref<8x128xf32, #tpu.memory_space<vmem>>) attributes {dimension_semantics = [#tpu.dimension_semantics<parallel>], iteration_bounds = array<i64: 1>, scalar_prefetch = 0 : i64, scratch_operands = 0 : i64, tpu.core_type = #tpu.core_type<tc>, window_params = [{transform_indices = @transform_0, window_bounds = array<i64: 1, 2>}, {transform_indices = @transform_1, window_bounds = array<i64: 1>}, {transform_indices = @transform_2, window_bounds = array<i64: 8, 128>}, {transform_indices = @transform_3, window_bounds = array<i64: 8, 128>}]} {
    %c0 = arith.constant 0 : index
    %c0_0 = arith.constant 0 : index
    %0 = vector.load %arg3[%c0, %c0_0] : memref<8x128xf32, #tpu.memory_space<vmem>>, vector<8x128xf32>
    %c0_1 = arith.constant 0 : index
    %1 = memref.load %arg2[%c0_1] : memref<1xf32, #tpu.memory_space<smem>>
    %2 = vector.broadcast %1 : f32 to vector<8x128xf32>
    %c0_2 = arith.constant 0 : index
    %c0_3 = arith.constant 0 : index
    %3 = memref.load %arg1[%c0_2, %c0_3] : memref<1x2xf32, #tpu.memory_space<smem>>
    %4 = vector.broadcast %3 : f32 to vector<8x128xf32>
    %5 = arith.mulf %4, %0 : vector<8x128xf32>
    %6 = arith.addf %2, %5 : vector<8x128xf32>
    %c127_i32 = arith.constant 127 : i32
    %7 = tpu.dynamic_rotate %0 by %c127_i32 dim 1 : vector<8x128xf32>, i32 -> vector<8x128xf32>
    %c0_4 = arith.constant 0 : index
    %c1 = arith.constant 1 : index
    %8 = memref.load %arg1[%c0_4, %c1] : memref<1x2xf32, #tpu.memory_space<smem>>
    %9 = vector.broadcast %8 : f32 to vector<8x128xf32>
    %10 = arith.mulf %9, %7 : vector<8x128xf32>
    %11 = arith.addf %6, %10 : vector<8x128xf32>
    %c0_5 = arith.constant 0 : index
    %c0_6 = arith.constant 0 : index
    %12 = vector.load %arg4[%c0_5, %c0_6] : memref<8x128xf32, #tpu.memory_space<vmem>>, vector<8x128xf32>
    tpu.vector_store %arg4[%c0_5, %c0_6], %11 {strides = array<i32>} : memref<8x128xf32, #tpu.memory_space<vmem>>, vector<8x128xf32>,
    return
  }
  func.func @transform_0(%arg0: i32) -> (i32, i32) {
    %c0_i32 = arith.constant 0 : i32
    %c0_i32_0 = arith.constant 0 : i32
    %c0_i32_1 = arith.constant 0 : i32
    return %c0_i32, %c0_i32_0 : i32, i32
  }
  func.func @transform_1(%arg0: i32) -> i32 {
    %c0_i32 = arith.constant 0 : i32
    %c0_i32_0 = arith.constant 0 : i32
    return %c0_i32 : i32
  }
  func.func @transform_2(%arg0: i32) -> (i32, i32) {
    %c0_i32 = arith.constant 0 : i32
    %c0_i32_0 = arith.constant 0 : i32
    return %arg0, %c0_i32 : i32, i32
  }
  func.func @transform_3(%arg0: i32) -> (i32, i32) {
    %c0_i32 = arith.constant 0 : i32
    %c0_i32_0 = arith.constant 0 : i32
    return %arg0, %c0_i32 : i32, i32
  }
}

</mosaic_0001>

<bundles_post_ra>
// kernel: tpu_custom_call.1
= control target key start
LH: loop header
LB: loop body
LE: loop exit
PB: predicated region body
PF: predicated region fallthrough
CT: control target
= control target key end

     0   :  { %9 = vsyncpa [#allocation6], 0  ;;  %s192_s0 = inlined_call_operand.vmem [shape: f32[1,2], index: 0, kind: input, shape index: {}]   ;;  %s193_s1 = inlined_call_operand.<no memory space> [shape: f32[1], index: 1, kind: input, shape index: {}]   ;;  %s194_s2 = inlined_call_operand.hbm [shape: f32[8,128], index: 2, kind: input, shape index: {}]   ;;  %s195_s3 = inlined_call_operand.hbm [shape: f32[8,128], index: 3, kind: output, shape index: {}]  }
   0x1   :  { %10 = vsyncpa [#allocation4], 0 }
   0x2   :  { %11 = vsyncpa [#allocation5], 0  ;;  %s18_s14 = sshll.u32 %s192_s0, 4  ;;  %s19_s14 = int_to_ptr.vmem [resolvable:$true] %s18_s14 }
   0x3   :  { %s76_s15 = scalar_lea.vmem %s19_s14, 16  ;;  %p81_p1 = scmp.lt.s32.totalorder %s19_s14, %s19_s14 }
   0x4   :  { %p77_p0 = scmp.ne.s32.totalorder %s19_s14, %s76_s15  ;;  %p82_p2 = scmp.lt.s32.totalorder %s76_s15, %s76_s15 }
   0x6   :  { %p83_p3 = por %p82_p2, %p81_p1 }
   0x8   :  { %p84_p4 = pnand %p83_p3, %p77_p0 }
   0xa   :  { %87 = shalt.err (!%p84_p4)
}
   0xb   :  { %s138_s16 = smov [#allocation3]   ;;  %s139_s17 = smov [#allocation7]  }
   0xc   :  { %21 = dma.vmem_to_smem %s19_s14, 16, %s138_s16, [#allocation6]  }
   0xd   :  { %s30_s18 = sshll.u32 %s139_s17, 4  ;;  %s88_s21 = scalar_lea.hbm %s194_s2, 128  ;;  %s31_s18 = int_to_ptr.vmem [resolvable:$true] %s30_s18 }
   0xe   :  { %p89_p5 = scmp.ne.s32.totalorder %s194_s2, %s88_s21  ;;  %p92_p6 = scmp.lt.u32.totalorder %s88_s21, %s194_s2 }
  0x10   :  { %p94_p7 = pnand %p92_p6, %p89_p5 }
  0x12   :  { %97 = shalt.err (!%p94_p7)
}
  0x13   :  { %s98_s25 = scalar_lea.vmem %s31_s18, 128  ;;  %p103_p9 = scmp.lt.s32.totalorder %s31_s18, %s31_s18 }
  0x14   :  { %p99_p8 = scmp.ne.s32.totalorder %s31_s18, %s98_s25  ;;  %p104_p10 = scmp.lt.s32.totalorder %s98_s25, %s98_s25 }
  0x16   :  { %p105_p11 = por %p104_p10, %p103_p9 }
  0x18   :  { %p106_p12 = pnand %p105_p11, %p99_p8 }
  0x1a   :  { %109 = shalt.err (!%p106_p12)
}
  0x1b   :  { %33 = dma.hbm_to_vmem [thread:$0]  %s194_s2, 128, %s31_s18, [#allocation4]  }
  0x1c   :  { %132 = dma.done.wait [#allocation6], 16  }
  0x1d   :  { %133 = vsyncadd [#allocation6], 4294967280 }
  0x1e   :  { %134 = dma.done.wait [#allocation4], 128  }
  0x1f   :  { %135 = vsyncadd [#allocation4], 4294967168 }
  0x20   :  { %40 = sfence }
  0x21   :  { %v41_v0 = vld [vmem:[#allocation7] sm:$0xff]  ;;  %s140_s28 = smov 127   ;;  %s44_s29 = sld [smem:[#allocation3]]  ;;  %v43_v3 = vstv %s193_s1 }
  0x22   :  { %48 = vrot.lane.b32.xlu0 %v41_v0, %s140_s28  ;;  %s71_s30 = sld [smem:[#allocation3 + $0x1]]  ;;  %s141_s2 = smov [#allocation8]  }
  0x23   :  { %s61_s6 = sshll.u32 %s141_s2, 4  ;;  %s62_s6 = int_to_ptr.vmem [resolvable:$true] %s61_s6 }
  0x24   :  { %s110_s7 = scalar_lea.vmem %s62_s6, 128  ;;  %p115_p0 = scmp.lt.s32.totalorder %s62_s6, %s62_s6 }
  0x25   :  { %p111_p13 = scmp.ne.s32.totalorder %s62_s6, %s110_s7  ;;  %p116_p1 = scmp.lt.s32.totalorder %s110_s7, %s110_s7 }
  0x27   :  { %v45_v1 = vstv %s44_s29  ;;  %p117_p2 = por %p116_p1, %p115_p0 }
  0x28   :  { %v46_v2 = vmul.f32 %v45_v1, %v41_v0  ;;  %v51_v4 = vstv %s71_s30 }
  0x29   :  { %p118_p3 = pnand %p117_p2, %p111_p13 }
  0x2a   :  { %v47_v5 = vadd.f32 %v46_v2, %v43_v3 }
  0x94   :  { %v49_v6 = vpop.permute.xlu0 %48 }
  0x95   :  { %v52_v7 = vmul.f32 %v51_v4, %v49_v6 }
  0x97   :  { %v53_v8 = vadd.f32 %v52_v7, %v47_v5 }
  0x99   :  { %54 = vst [vmem:[#allocation8] sm:$0xff] %v53_v8 }
  0x9a   :  { %121 = shalt.err (!%p118_p3)
}
  0x9b   :  { %s122_s1 = scalar_lea.hbm %s195_s3, 128 }
  0x9c   :  { %p123_p4 = scmp.ne.s32.totalorder %s195_s3, %s122_s1  ;;  %p126_p5 = scmp.lt.u32.totalorder %s122_s1, %s195_s3 }
  0x9e   :  { %p128_p6 = pnand %p126_p5, %p123_p4 }
  0xa0   :  { %131 = shalt.err (!%p128_p6)
}
  0xa1   :  { %64 = dma.vmem_to_hbm [thread:$0]  %s62_s6, 128, %s195_s3, [#allocation5]  }
  0xa2   :  { %136 = dma.done.wait [#allocation5], 128  }
  0xa3   :  { %137 = vsyncadd [#allocation5], 4294967168 }
  0xa4   :  { %68 = vsyncpa [#allocation4], 1 }
  0xa5   :  { %69 = vsyncpa [#allocation5], 1 }
  0xa6   :  { %70 = vsyncpa [#allocation6], 1 }

</bundles_post_ra>
